<compile_context>
chip_gen: v7x
topology: tpu7x:2x2x1
jax: 0.10.0
libtpu: 0.0.40
codegen_flags: <defaults>
</compile_context>

<pallas_src>
import functools

import jax
import jax.numpy as jnp
from jax.experimental import pallas as pl
from jax.experimental.pallas import tpu as pltpu

LANE = 128        # pad the style/logit axis to one full vreg lane width
NEG_INF = -1e30   # bias padding: exp(NEG_INF - m) underflows to exactly 0


def style_head_kernel(x_ref, p_ref, probs_ref, *, input_dim):
    """One batch tile: logits = x @ W + b, softmax over the padded 128-lane axis."""
    x = x_ref[...]                                   # native dtype (bf16 or f32)
    w = p_ref[:input_dim, :]                         # static ref slice: no runtime cost
    if w.dtype != x.dtype:                           # keep the dot in x's dtype (bf16 MXU path)
        w = w.astype(x.dtype)
    b = p_ref[input_dim:input_dim + 1, :].astype(jnp.float32)

    logits = jnp.dot(x, w, preferred_element_type=jnp.float32) + b
    # Padded lanes carry NEG_INF from the bias row, so the full-row softmax is
    # exactly the softmax over the real num_styles logits (padded probs == 0).
    m = jnp.max(logits, axis=-1, keepdims=True)
    e = jnp.exp(logits - m)
    denom = jnp.sum(e, axis=-1, keepdims=True)
    probs = e / denom                                # exact divide: rows sum to 1
    probs_ref[...] = probs.astype(probs_ref.dtype)


def pack_params(w, b, num_styles, dtype=jnp.float32):
    """Pack (input_dim, num_styles) weight + (num_styles,) bias into one slab."""
    input_dim = w.shape[0]
    slab = jnp.zeros((input_dim + 1, LANE), jnp.float32)
    slab = slab.at[:input_dim, :num_styles].set(w.astype(jnp.float32))
    bias_row = jnp.full((LANE,), NEG_INF, jnp.float32)
    bias_row = bias_row.at[:num_styles].set(b.astype(jnp.float32))
    slab = slab.at[input_dim, :].set(bias_row)
    return slab.astype(dtype)                        # -1e30 is representable in bf16


def _pick_batch_tile(batch, input_dim, batch_tile, x_bytes, o_bytes, p_bytes,
                     vmem_budget=24 << 20):
    """Largest multiple-of-8 tile <= batch_tile whose double-buffered footprint
    fits ~24 MiB (headroom under v7x's 64 MiB physical / 32 MiB scoped VMEM)."""
    tb = min(batch_tile, -(-batch // 8) * 8)
    tb = max(8, (tb // 8) * 8)
    param_foot = 2 * (input_dim + 1) * LANE * p_bytes
    while tb > 8:
        need = 2 * tb * input_dim * x_bytes + 2 * tb * LANE * o_bytes + param_foot
        if need <= vmem_budget:
            break
        tb = max(8, ((tb // 2) // 8) * 8)
    return tb


def style_head(x, packed_params, num_styles, *, return_selection=False,
               batch_tile=512, out_dtype=None):
    """Pallas-backed StyleHead.forward. x: (B, input_dim) -> probs (B, num_styles)."""
    styles = ("aggressive", "moderate", "conservative")
    batch, input_dim = x.shape
    out_dtype = jnp.dtype(out_dtype) if out_dtype is not None else x.dtype

    kernel = functools.partial(style_head_kernel, input_dim=input_dim)
    x_bytes = jnp.dtype(x.dtype).itemsize
    o_bytes = jnp.dtype(out_dtype).itemsize
    p_bytes = jnp.dtype(packed_params.dtype).itemsize

    if batch <= batch_tile:
        # Small-batch fast path: full-array blocks (exempt from the (8,128)
        # divisibility rule) -> no pad kernel, no padded compute, grid=(1,).
        tb, b_pad, x_in = batch, batch, x
    else:
        tb = _pick_batch_tile(batch, input_dim, batch_tile, x_bytes, o_bytes, p_bytes)
        b_pad = -(-batch // tb) * tb
        x_in = jnp.pad(x, ((0, b_pad - batch), (0, 0))) if b_pad != batch else x

    probs_padded = pl.pallas_call(
        kernel,
        out_shape=jax.ShapeDtypeStruct((b_pad, LANE), out_dtype),
        grid=(b_pad // tb,),
        in_specs=[
            pl.BlockSpec((tb, input_dim), lambda i: (i, 0)),
            pl.BlockSpec((input_dim + 1, LANE), lambda i: (0, 0)),  # VMEM-resident params
        ],
        out_specs=pl.BlockSpec((tb, LANE), lambda i: (i, 0)),
        compiler_params=pltpu.CompilerParams(
            dimension_semantics=("parallel",)),      # megacore sharding on v7x
    )(x_in, packed_params)

    probs = probs_padded[:batch, :num_styles]
    if return_selection:
        # Mirrors torch.argmax(probabilities).item() + python list lookup; like
        # the PyTorch module, this flattened argmax is intended for batch == 1.
        selected = int(jnp.argmax(probs))
        return probs, selected, styles[selected]
    return probs


def _reference(x, w, b):
    logits = jnp.dot(x.astype(jnp.float32), w.astype(jnp.float32),
                     precision=jax.lax.Precision.HIGHEST) + b.astype(jnp.float32)
    return jax.nn.softmax(logits, axis=-1)


if __name__ == "__main__":
    batch, input_dim, num_styles = 2, 32, 3

    key = jax.random.PRNGKey(0)
    kx, kw, kb = jax.random.split(key, 3)

    x32 = jax.random.normal(kx, (batch, input_dim), jnp.float32)

    # Kaiming-normal (fan_in, relu) weight + default nn.Linear uniform bias,
    # stored as (in, out) so the kernel computes y = x @ W + b on the MXU.
    std = (2.0 / input_dim) ** 0.5
    w = jax.random.normal(kw, (input_dim, num_styles), jnp.float32) * std
    bound = 1.0 / (input_dim ** 0.5)
    b = jax.random.uniform(kb, (num_styles,), jnp.float32, -bound, bound)

    probs_ref = _reference(x32, w, b)

    # --- f32 path (faithful to the PyTorch module's dtype) ---------------------
    packed_f32 = pack_params(w, b, num_styles, dtype=jnp.float32)
    probs = style_head(x32, packed_f32, num_styles)
    jax.block_until_ready(probs)
    assert probs.shape == (batch, num_styles)
    assert probs.dtype == jnp.float32
    assert jnp.allclose(probs, probs_ref, atol=2e-3, rtol=2e-3)
    assert jnp.allclose(probs.sum(-1), 1.0, atol=1e-4)          # exact divide

    # --- bf16 path (halved x-read + probs-writeback HBM bytes) -----------------
    x16 = x32.astype(jnp.bfloat16)
    packed_bf16 = pack_params(w, b, num_styles, dtype=jnp.bfloat16)
    probs16 = style_head(x16, packed_bf16, num_styles)
    jax.block_until_ready(probs16)
    assert probs16.dtype == jnp.bfloat16
    p16 = probs16.astype(jnp.float32)
    assert jnp.allclose(p16, probs_ref, atol=5e-2, rtol=5e-2)
    assert jnp.allclose(p16.sum(-1), 1.0, atol=2e-2)

    # --- padded multi-step grid path (exercises tiling + batch padding) --------
    xg = jax.random.normal(jax.random.PRNGKey(1), (40, input_dim), jnp.float32)
    probs_g = style_head(xg, packed_f32, num_styles, batch_tile=16)
    jax.block_until_ready(probs_g)
    assert probs_g.shape == (40, num_styles)
    assert jnp.allclose(probs_g, _reference(xg, w, b), atol=2e-3, rtol=2e-3)
    assert jnp.allclose(probs_g.sum(-1), 1.0, atol=1e-4)

    # --- return_selection path (single example, as the PyTorch usage implies) --
    p1, sel, name = style_head(x32[:1], packed_f32, num_styles, return_selection=True)
    jax.block_until_ready(p1)
    assert p1.shape == (1, num_styles)
    assert 0 <= sel < num_styles and name in ("aggressive", "moderate", "conservative")

    print("KERNEL_OK")
</pallas_src>

<mosaic_0001>
module attributes {stable_mosaic.version = 11 : i64} {
  func.func @style_head_kernel(%arg0: i32, %arg1: memref<2x32xf32, #tpu.memory_space<vmem>>, %arg2: memref<33x128xf32, #tpu.memory_space<vmem>>, %arg3: memref<2x128xf32, #tpu.memory_space<vmem>>) attributes {dimension_semantics = [#tpu.dimension_semantics<parallel>], iteration_bounds = array<i64: 1>, scalar_prefetch = 0 : i64, scratch_operands = 0 : i64, tpu.core_type = #tpu.core_type<tc>, window_params = [{transform_indices = @transform_0, window_bounds = array<i64: 2, 32>}, {pipeline_mode = #tpu.pipeline_mode<synchronous>, transform_indices = @transform_1, window_bounds = array<i64: 33, 128>}, {transform_indices = @transform_2, window_bounds = array<i64: 2, 128>}]} {
    %c0 = arith.constant 0 : index
    %c0_0 = arith.constant 0 : index
    %0 = vector.load %arg1[%c0, %c0_0] : memref<2x32xf32, #tpu.memory_space<vmem>>, vector<2x32xf32>
    %c0_1 = arith.constant 0 : index
    %c0_2 = arith.constant 0 : index
    %1 = vector.load %arg2[%c0_1, %c0_2] : memref<33x128xf32, #tpu.memory_space<vmem>>, vector<32x128xf32>
    %c32 = arith.constant 32 : index
    %c0_3 = arith.constant 0 : index
    %2 = vector.load %arg2[%c32, %c0_3] : memref<33x128xf32, #tpu.memory_space<vmem>>, vector<1x128xf32>
    %cst = arith.constant dense<0.000000e+00> : vector<2x128xf32>
    %3 = tpu.matmul %0, %1, %cst {dimension_numbers = #tpu.dot_dimension_numbers<[1], [0], [0], [1], [0, 0, 1, 1], [], []>} : vector<2x32xf32>, vector<32x128xf32>, vector<2x128xf32> -> vector<2x128xf32>
    %4 = vector.broadcast %2 : vector<1x128xf32> to vector<2x128xf32>
    %5 = arith.addf %3, %4 : vector<2x128xf32>
    %cst_4 = arith.constant dense<0xFF800000> : vector<2xf32>
    %6 = vector.multi_reduction <maximumf>, %5, %cst_4 [1] : vector<2x128xf32> to vector<2xf32>
    %7 = vector.shape_cast %6 : vector<2xf32> to vector<2x1xf32>
    %8 = vector.broadcast %7 : vector<2x1xf32> to vector<2x128xf32>
    %9 = arith.subf %5, %8 : vector<2x128xf32>
    %10 = math.exp %9 : vector<2x128xf32>
    %cst_5 = arith.constant dense<0.000000e+00> : vector<2xf32>
    %11 = vector.multi_reduction <add>, %10, %cst_5 [1] : vector<2x128xf32> to vector<2xf32>
    %12 = vector.shape_cast %11 : vector<2xf32> to vector<2x1xf32>
    %13 = vector.broadcast %12 : vector<2x1xf32> to vector<2x128xf32>
    %14 = arith.divf %10, %13 : vector<2x128xf32>
    %c0_6 = arith.constant 0 : index
    %c0_7 = arith.constant 0 : index
    %15 = vector.load %arg3[%c0_6, %c0_7] : memref<2x128xf32, #tpu.memory_space<vmem>>, vector<2x128xf32>
    tpu.vector_store %arg3[%c0_6, %c0_7], %14 {strides = array<i32>} : memref<2x128xf32, #tpu.memory_space<vmem>>, vector<2x128xf32>,
    return
  }
  func.func @transform_0(%arg0: i32) -> (i32, i32) {
    %c0_i32 = arith.constant 0 : i32
    %c0_i32_0 = arith.constant 0 : i32
    return %arg0, %c0_i32 : i32, i32
  }
  func.func @transform_1(%arg0: i32) -> (i32, i32) {
    %c0_i32 = arith.constant 0 : i32
    %c0_i32_0 = arith.constant 0 : i32
    %c0_i32_1 = arith.constant 0 : i32
    return %c0_i32, %c0_i32_0 : i32, i32
  }
  func.func @transform_2(%arg0: i32) -> (i32, i32) {
    %c0_i32 = arith.constant 0 : i32
    %c0_i32_0 = arith.constant 0 : i32
    return %arg0, %c0_i32 : i32, i32
  }
}

</mosaic_0001>

<bundles_post_ra>
// kernel: tpu_custom_call.1
= control target key start
LH: loop header
LB: loop body
LE: loop exit
PB: predicated region body
PF: predicated region fallthrough
CT: control target
= control target key end

     0   :  { %7 = vsyncpa [#allocation3], 0  ;;  %s325_s0 = inlined_call_operand.hbm [shape: f32[2,32], index: 0, kind: input, shape index: {}]   ;;  %s326_s1 = inlined_call_operand.hbm [shape: f32[33,128], index: 1, kind: input, shape index: {}]   ;;  %s327_s2 = inlined_call_operand.hbm [shape: f32[2,128], index: 2, kind: output, shape index: {}]  }
   0x1   :  { %8 = vsyncpa [#allocation6], 0 }
   0x2   :  { %9 = vsyncpa [#allocation4], 0  ;;  %s259_s9 = smov [#allocation2]   ;;  %s260_s11 = smov [#allocation5]  }
   0x3   :  { %s16_s10 = sshll.u32 %s259_s9, 4  ;;  %s25_s12 = sshll.u32 %s260_s11, 4  ;;  %s17_s10 = int_to_ptr.vmem [resolvable:$true] %s16_s10  ;;  %s282_s12 = int_to_ptr.vmem [resolvable:$true] %s25_s12 }
   0x4   :  { %s187_s15 = scalar_lea.hbm %s325_s0, 32 }
   0x5   :  { %p188_p0 = scmp.ne.s32.totalorder %s325_s0, %s187_s15  ;;  %p191_p1 = scmp.lt.u32.totalorder %s187_s15, %s325_s0 }
   0x7   :  { %p193_p2 = pnand %p191_p1, %p188_p0 }
   0x9   :  { %196 = shalt.err (!%p193_p2)
}
   0xa   :  { %s197_s20 = scalar_lea.vmem %s17_s10, 32  ;;  %p202_p4 = scmp.lt.s32.totalorder %s17_s10, %s17_s10 }
   0xb   :  { %p198_p3 = scmp.ne.s32.totalorder %s17_s10, %s197_s20  ;;  %p203_p5 = scmp.lt.s32.totalorder %s197_s20, %s197_s20 }
   0xd   :  { %p204_p6 = por %p203_p5, %p202_p4 }
   0xf   :  { %p205_p7 = pnand %p204_p6, %p198_p3 }
  0x11   :  { %208 = shalt.err (!%p205_p7)
}
  0x12   :  { %19 = dma.hbm_to_vmem [thread:$0]  %s325_s0, 32, %s17_s10, [#allocation3]  }
  0x13   :  { %s209_s25 = scalar_lea.hbm %s326_s1, 640 }
  0x14   :  { %p210_p8 = scmp.ne.s32.totalorder %s326_s1, %s209_s25  ;;  %p213_p9 = scmp.lt.u32.totalorder %s209_s25, %s326_s1 }
  0x16   :  { %p215_p10 = pnand %p213_p9, %p210_p8 }
  0x18   :  { %218 = shalt.err (!%p215_p10)
}
  0x19   :  { %s219_s30 = scalar_lea.vmem %s282_s12, 640  ;;  %p224_p12 = scmp.lt.s32.totalorder %s282_s12, %s282_s12 }
  0x1a   :  { %p220_p11 = scmp.ne.s32.totalorder %s282_s12, %s219_s30  ;;  %p225_p13 = scmp.lt.s32.totalorder %s219_s30, %s219_s30 }
  0x1c   :  { %p226_p0 = por %p225_p13, %p224_p12 }
  0x1e   :  { %p227_p1 = pnand %p226_p0, %p220_p11 }
  0x20   :  { %230 = shalt.err (!%p227_p1)
}
  0x21   :  { %s261_s0 = smov 128   ;;  %s262_s3 = smov 8  }
  0x22   :  { %31 = dma.hbm_to_vmem [thread:$0]  %s326_s1, 640, %s282_s12, [#allocation6], %s261_s0, %s261_s0, %s262_s3  }
  0x23   :  { %253 = dma.done.wait [#allocation3], 32  }
  0x24   :  { %254 = vsyncadd [#allocation3], 4294967264 }
  0x25   :  { %255 = dma.done.wait [#allocation6], 640  }
  0x26   :  { %256 = vsyncadd [#allocation6], 4294966656  ;;  %v263_v0 = vmov 0.0|0.0   ;;  %vm264_vm0 = vmmov 0   ;;  %v265_v1 = vmov 0.0   ;;  %v39_v2 = vld [vmem:[#allocation5] sm:$0xff] }
  0x27   :  { %169 = vmatprep.subr.bf16.mxu0 %v263_v0  ;;  %166 = vmatprep.mubr.msk.f32.mxu0 %vm264_vm0, %v265_v1  ;;  %v40_v3 = vld [vmem:[#allocation5 + $0x8] sm:$0xff]  ;;  %v41_v4 = vld [vmem:[#allocation5 + $0x10] sm:$0xff]  ;;  %v42_v6 = vld [vmem:[#allocation5 + $0x18] sm:$0xff]  ;;  %vm48_vm1 = vcmask 261120   ;;  %vm122_vm2 = vcmask 1041408   ;;  %s266_s1 = smov [#allocation7]  }
  0x28   :  { %v170_v5 = vpack.c.bf16 %v40_v3, %v39_v2  ;;  %v173_v7 = vpack.c.bf16 %v42_v6, %v41_v4  ;;  %v38_v8 = vld [vmem:[#allocation2] sm:$0x3]  ;;  %v151_v9 = vld [vmem:[#allocation5 + $0x20] ss:$0 sm:$0xff]  ;;  %s141_s6 = sshll.u32 %s266_s1, 4  ;;  %s142_s6 = int_to_ptr.vmem [resolvable:$true] %s141_s6 }
  0x29   :  { %s231_s7 = scalar_lea.vmem %s142_s6, 32  ;;  %p236_p3 = scmp.lt.s32.totalorder %s142_s6, %s142_s6 }
  0x2a   :  { %171 = vmatpush3.bf16.msra.mxu0 %v170_v5  ;;  %p232_p2 = scmp.ne.s32.totalorder %s142_s6, %s231_s7  ;;  %p237_p4 = scmp.lt.s32.totalorder %s231_s7, %s231_s7 }
  0x2b   :  { %172 = vmatprep.subr.bf16.mxu0 %v263_v0 }
  0x2c   :  { %p238_p5 = por %p237_p4, %p236_p3 }
  0x2e   :  { %174 = vmatpush3.bf16.msra.mxu0 %v173_v7  ;;  %p239_p6 = pnand %p238_p5, %p232_p2 }
  0x31   :  { %167 = vmatmul.mubr.msk.f32.vlgmr.msra.gmra.mrb[0].mxu0 %vm48_vm1, %v38_v8 }
 0x104   :  { %v118_v10 = vpop.f32.mrb[0].mxu0 }
 0x105   :  { %v119_v11 = vadd.f32 %v151_v9, %v118_v10  ;;  %v168_v12 = vpop.f32.mrb[1].mxu0 }
 0x107   :  { %v123_v13 = vsel %vm122_vm2, %v119_v11, -inf }
 0x108   :  { %124 = vmax.xlane.f32.xlu0 %v123_v13 }
 0x195   :  { %v125_v14 = vpop.xlane.xlu0 %124 }
 0x196   :  { %v126_v15 = vsub.f32 %v119_v11, %v125_v14 }
 0x198   :  { %v127_v16 = vmul.f32 1.442695, %v126_v15 }
 0x19a   :  { %183 = vpow2.f32 %v127_v16 }
 0x1a4   :  { %v184_v17 = vpop.eup %183 }
 0x1a5   :  { %v129_v18 = vsel %vm122_vm2, %v184_v17, 0.0 }
 0x1a6   :  { %130 = vadd.xlane.f32.xlu0 %v129_v18 }
 0x233   :  { %v131_v19 = vpop.xlane.xlu0 %130 }
 0x234   :  { %185 = vrcp.f32 %v131_v19 }
 0x23e   :  { %v186_v20 = vpop.eup %185 }
 0x23f   :  { %v133_v21 = vmul.f32 %v186_v20, %v184_v17 }
 0x241   :  { %134 = vst [vmem:[#allocation7] sm:$0x3] %v133_v21 }
 0x242   :  { %242 = shalt.err (!%p239_p6)
}
 0x243   :  { %s243_s10 = scalar_lea.hbm %s327_s2, 32 }
 0x244   :  { %p244_p7 = scmp.ne.s32.totalorder %s327_s2, %s243_s10  ;;  %p247_p8 = scmp.lt.u32.totalorder %s243_s10, %s327_s2 }
 0x246   :  { %p249_p9 = pnand %p247_p8, %p244_p7 }
 0x248   :  { %252 = shalt.err (!%p249_p9)
}
 0x249   :  { %144 = dma.vmem_to_hbm [thread:$0]  %s142_s6, 32, %s327_s2, [#allocation4]  }
 0x24a   :  { %257 = dma.done.wait [#allocation4], 32  }
 0x24b   :  { %258 = vsyncadd [#allocation4], 4294967264 }
 0x24c   :  { %148 = vsyncpa [#allocation3], 1 }
 0x24d   :  { %149 = vsyncpa [#allocation6], 1 }
 0x24e   :  { %150 = vsyncpa [#allocation4], 1 }

</bundles_post_ra>
